<compile_context>
chip_gen: v7x
topology: tpu7x:2x2x1
jax: 0.10.0
libtpu: 0.0.40
codegen_flags: <defaults>
</compile_context>

<pallas_src>
import functools

import jax
import jax.numpy as jnp
import numpy as np
from jax.experimental import pallas as pl
from jax.experimental.pallas import tpu as pltpu


def _round_up(x: int, m: int) -> int:
    return ((x + m - 1) // m) * m


def _dft_matrix(n: int, n_pad: int, dtype):
    """Ortho-normalized DFT matrix split into real/imag parts, embedded in the
    top-left corner of an (n_pad, n_pad) zero block (padded rows/cols contribute
    nothing, so zero-padded inputs give exactly the unpadded result)."""
    idx = np.arange(n)
    ang = -2.0 * np.pi * np.outer(idx, idx) / n
    scale = 1.0 / np.sqrt(n)
    fr = np.zeros((n_pad, n_pad), np.float32)
    fi = np.zeros((n_pad, n_pad), np.float32)
    fr[:n, :n] = np.cos(ang) * scale
    fi[:n, :n] = np.sin(ang) * scale
    return jnp.asarray(fr, dtype=dtype), jnp.asarray(fi, dtype=dtype)


def _cmatmul3(ar, ai, a_s, br, bi, b_s, dtype, conj):
    """Complex matmul via the Gauss 3-real-matmul trick.

    conj=False: (ar + i*ai) @ (br + i*bi), with a_s = ar+ai, b_s = br+bi.
    conj=True : exactly one factor is conjugated; pass that factor's signed sum
                (e.g. a_s = ar-ai for conj(A) @ B, or b_s = br-bi for A @ conj(B)).
    Matmul operands are cast to `dtype` (f32 or bf16); accumulation is f32.
    """
    p1 = jnp.dot(ar.astype(dtype), br.astype(dtype), preferred_element_type=jnp.float32)
    q2 = jnp.dot(ai.astype(dtype), bi.astype(dtype), preferred_element_type=jnp.float32)
    p3 = jnp.dot(a_s.astype(dtype), b_s.astype(dtype), preferred_element_type=jnp.float32)
    if conj:
        return p1 + q2, p3 - p1 + q2
    return p1 - q2, p3 - p1 - q2


def _dc_kernel(im_ref, k0_ref, mask_ref, fhr_ref, fhi_ref, fwr_ref, fwi_ref,
               out_ref, *, is_data_fidelity: bool, batch_tile: int, matmul_dtype):
    dt = matmul_dtype

    # Constant DFT factors: load once per grid step, hoist the Gauss sums so
    # they are not recomputed per image / per stage.
    fhr = fhr_ref[...]
    fhi = fhi_ref[...]
    fwr = fwr_ref[...]
    fwi = fwi_ref[...]
    fh_sum = fhr + fhi      # forward FFT, left factor  F_H
    fw_sum = fwr + fwi      # forward FFT, right factor F_W
    fh_dif = fhr - fhi      # inverse FFT, conj(F_H)
    fw_dif = fwr - fwi      # inverse FFT, conj(F_W)

    for b in range(batch_tile):      # static, unrolled
        xr = im_ref[b, 0, :, :]
        xi = im_ref[b, 1, :, :]

        # k = F_H @ x @ F_W   (2-D ortho FFT, MXU, 6 real matmuls)
        tr, ti = _cmatmul3(fhr, fhi, fh_sum, xr, xi, xr + xi, dt, conj=False)
        kr, ki = _cmatmul3(tr, ti, tr + ti, fwr, fwi, fw_sum, dt, conj=False)

        # Data consistency (elementwise, f32, VPU).
        m = mask_ref[b, :, :]
        k0r = k0_ref[b, 0, :, :]
        k0i = k0_ref[b, 1, :, :]
        if is_data_fidelity:
            # Faithful to the original `v = self.is_data_fidelity` (True -> 1.0):
            #   (1-m)*k + m*(k + v*k0/(1+v))  ==  k + m*(v/(1+v))*k0
            v = 1.0
            c = v / (1.0 + v)
            kdr = kr + m * (c * k0r)
            kdi = ki + m * (c * k0i)
        else:
            # (1-m)*k + m*k0  ==  k + m*(k0 - k)
            kdr = kr + m * (k0r - kr)
            kdi = ki + m * (k0i - ki)

        # im_dc = conj(F_H) @ k_dc @ conj(F_W)   (2-D ortho IFFT, 6 real matmuls)
        tr2, ti2 = _cmatmul3(fhr, fhi, fh_dif, kdr, kdi, kdr + kdi, dt, conj=True)
        o_r, o_i = _cmatmul3(tr2, ti2, tr2 + ti2, fwr, fwi, fw_dif, dt, conj=True)

        out_ref[b, 0, :, :] = o_r
        out_ref[b, 1, :, :] = o_i


def data_consistency_layer(im, k0, mask, *,
                           is_data_fidelity: bool = False,
                           data_fidelity_param=None,
                           use_bf16_matmul: bool = False,
                           batch_tile: int = 1,
                           single_buffer_dft: bool = False,
                           alias_im_to_output: bool = False):
    """Pallas implementation of DataConsistencyLayer.forward."""
    del data_fidelity_param  # created in __init__ but never used by the original forward
    N, C, H, W = im.shape
    assert C == 2, "expected pseudo-complex NCHW input with 2 channels"
    assert k0.shape == (N, 2, H, W)
    assert mask.shape == (N, H, W)
    assert N % batch_tile == 0, "batch_tile must divide the batch size"

    # Lane/sublane-dense padding: last dim -> multiple of 128, H -> multiple of 8.
    Hp = _round_up(H, 8)
    Wp = _round_up(W, 128)

    im_p = im.astype(jnp.float32)
    k0_p = k0.astype(jnp.float32)
    mask_p = mask.astype(jnp.float32)
    if (Hp, Wp) != (H, W):
        pad_nchw = ((0, 0), (0, 0), (0, Hp - H), (0, Wp - W))
        im_p = jnp.pad(im_p, pad_nchw)
        k0_p = jnp.pad(k0_p, pad_nchw)
        mask_p = jnp.pad(mask_p, ((0, 0), (0, Hp - H), (0, Wp - W)))

    mm_dtype = jnp.bfloat16 if use_bf16_matmul else jnp.float32
    fhr, fhi = _dft_matrix(H, Hp, mm_dtype)
    fwr, fwi = _dft_matrix(W, Wp, mm_dtype)

    def _const_spec(d):
        # Constant blocks (index_map always (0,0)); optionally single-buffered
        # to save VMEM at large H, W (matters on v7x's 64 MiB VMEM).
        kw = {"pipeline_mode": pl.Buffered(1)} if single_buffer_dft else {}
        return pl.BlockSpec((d, d), lambda n: (0, 0), **kw)

    kernel = functools.partial(_dc_kernel,
                               is_data_fidelity=is_data_fidelity,
                               batch_tile=batch_tile,
                               matmul_dtype=mm_dtype)

    extra = {}
    if alias_im_to_output:
        # Only safe if the caller does not reuse `im` after this call.
        extra["input_output_aliases"] = {0: 0}

    out = pl.pallas_call(
        kernel,
        out_shape=jax.ShapeDtypeStruct((N, 2, Hp, Wp), jnp.float32),
        grid_spec=pltpu.PrefetchScalarGridSpec(
            num_scalar_prefetch=0,
            grid=(N // batch_tile,),
            in_specs=[
                pl.BlockSpec((batch_tile, 2, Hp, Wp), lambda n: (n, 0, 0, 0)),  # im
                pl.BlockSpec((batch_tile, 2, Hp, Wp), lambda n: (n, 0, 0, 0)),  # k0
                pl.BlockSpec((batch_tile, Hp, Wp), lambda n: (n, 0, 0)),        # mask
                _const_spec(Hp),   # F_H real
                _const_spec(Hp),   # F_H imag
                _const_spec(Wp),   # F_W real
                _const_spec(Wp),   # F_W imag
            ],
            out_specs=pl.BlockSpec((batch_tile, 2, Hp, Wp), lambda n: (n, 0, 0, 0)),
        ),
        compiler_params=pltpu.CompilerParams(dimension_semantics=("parallel",)),
        **extra,
    )(im_p, k0_p, mask_p, fhr, fhi, fwr, fwi)

    if (Hp, Wp) != (H, W):
        out = out[:, :, :H, :W]
    return out


def _reference_forward(im, k0, mask, is_data_fidelity: bool = False):
    """Pure-JAX reference (fft2/ifft2, norm='ortho'), mirroring the PyTorch forward."""
    x = im[:, 0] + 1j * im[:, 1]
    k = jnp.fft.fft2(x, norm="ortho")
    k0c = k0[:, 0] + 1j * k0[:, 1]
    if is_data_fidelity:
        v = 1.0  # bool True -> 1.0, as in the original `v = self.is_data_fidelity`
        kdc = (1.0 - mask) * k + mask * (k + v * k0c / (1.0 + v))
    else:
        kdc = (1.0 - mask) * k + mask * k0c
    imdc = jnp.fft.ifft2(kdc, norm="ortho")
    return jnp.stack([imdc.real, imdc.imag], axis=1).astype(jnp.float32)


if __name__ == "__main__":
    key = jax.random.PRNGKey(0)
    k_im, k_k0, k_mask, k_param = jax.random.split(key, 4)

    N, H, W = 2, 16, 16
    im = jax.random.normal(k_im, (N, 2, H, W), dtype=jnp.float32)
    k0 = jax.random.normal(k_k0, (N, 2, H, W), dtype=jnp.float32)
    mask = (jax.random.uniform(k_mask, (N, H, W)) > 0.5).astype(jnp.float32)

    # Deterministic init of the (unused-by-forward) data_fidelity parameter, shape (1,).
    data_fidelity_param = jax.random.normal(k_param, (1,), dtype=jnp.float32)

    # Default f32-matmul path: strict check against fft2/ifft2 reference.
    out = jax.block_until_ready(data_consistency_layer(im, k0, mask))
    ref = _reference_forward(im, k0, mask)
    np.testing.assert_allclose(np.asarray(out), np.asarray(ref), rtol=1e-3, atol=1e-3)

    # is_data_fidelity=True path (faithful to the PyTorch blend with v = True -> 1.0).
    out_df = jax.block_until_ready(
        data_consistency_layer(im, k0, mask, is_data_fidelity=True,
                               data_fidelity_param=data_fidelity_param))
    ref_df = _reference_forward(im, k0, mask, is_data_fidelity=True)
    np.testing.assert_allclose(np.asarray(out_df), np.asarray(ref_df), rtol=1e-3, atol=1e-3)

    # bf16-matmul-operand path: looser tolerance (re-validate per production image size).
    out_bf16 = jax.block_until_ready(
        data_consistency_layer(im, k0, mask, use_bf16_matmul=True))
    np.testing.assert_allclose(np.asarray(out_bf16), np.asarray(ref), rtol=0.0, atol=1e-1)

    print("KERNEL_OK")
</pallas_src>

<mosaic_0001>
module attributes {stable_mosaic.version = 11 : i64} {
  func.func @_dc_kernel(%arg0: i32, %arg1: memref<1x2x16x128xf32, #tpu.memory_space<vmem>>, %arg2: memref<1x2x16x128xf32, #tpu.memory_space<vmem>>, %arg3: memref<1x16x128xf32, #tpu.memory_space<vmem>>, %arg4: memref<16x16xf32, #tpu.memory_space<vmem>>, %arg5: memref<16x16xf32, #tpu.memory_space<vmem>>, %arg6: memref<128x128xf32, #tpu.memory_space<vmem>>, %arg7: memref<128x128xf32, #tpu.memory_space<vmem>>, %arg8: memref<1x2x16x128xf32, #tpu.memory_space<vmem>>) attributes {dimension_semantics = [#tpu.dimension_semantics<parallel>], iteration_bounds = array<i64: 2>, scalar_prefetch = 0 : i64, scratch_operands = 0 : i64, tpu.core_type = #tpu.core_type<tc>, window_params = [{transform_indices = @transform_0, window_bounds = array<i64: 1, 2, 16, 128>}, {transform_indices = @transform_1, window_bounds = array<i64: 1, 2, 16, 128>}, {transform_indices = @transform_2, window_bounds = array<i64: 1, 16, 128>}, {pipeline_mode = #tpu.pipeline_mode<synchronous>, transform_indices = @transform_3, window_bounds = array<i64: 16, 16>}, {pipeline_mode = #tpu.pipeline_mode<synchronous>, transform_indices = @transform_4, window_bounds = array<i64: 16, 16>}, {pipeline_mode = #tpu.pipeline_mode<synchronous>, transform_indices = @transform_5, window_bounds = array<i64: 128, 128>}, {pipeline_mode = #tpu.pipeline_mode<synchronous>, transform_indices = @transform_6, window_bounds = array<i64: 128, 128>}, {transform_indices = @transform_7, window_bounds = array<i64: 1, 2, 16, 128>}]} {
    %c0 = arith.constant 0 : index
    %c0_0 = arith.constant 0 : index
    %0 = vector.load %arg4[%c0, %c0_0] : memref<16x16xf32, #tpu.memory_space<vmem>>, vector<16x16xf32>
    %c0_1 = arith.constant 0 : index
    %c0_2 = arith.constant 0 : index
    %1 = vector.load %arg5[%c0_1, %c0_2] : memref<16x16xf32, #tpu.memory_space<vmem>>, vector<16x16xf32>
    %c0_3 = arith.constant 0 : index
    %c0_4 = arith.constant 0 : index
    %2 = vector.load %arg6[%c0_3, %c0_4] : memref<128x128xf32, #tpu.memory_space<vmem>>, vector<128x128xf32>
    %c0_5 = arith.constant 0 : index
    %c0_6 = arith.constant 0 : index
    %3 = vector.load %arg7[%c0_5, %c0_6] : memref<128x128xf32, #tpu.memory_space<vmem>>, vector<128x128xf32>
    %4 = arith.addf %0, %1 : vector<16x16xf32>
    %5 = arith.addf %2, %3 : vector<128x128xf32>
    %6 = arith.subf %0, %1 : vector<16x16xf32>
    %7 = arith.subf %2, %3 : vector<128x128xf32>
    %c0_7 = arith.constant 0 : index
    %c0_8 = arith.constant 0 : index
    %c0_9 = arith.constant 0 : index
    %c0_10 = arith.constant 0 : index
    %8 = vector.load %arg1[%c0_7, %c0_8, %c0_9, %c0_10] : memref<1x2x16x128xf32, #tpu.memory_space<vmem>>, vector<1x1x16x128xf32>
    %9 = vector.shape_cast %8 : vector<1x1x16x128xf32> to vector<16x128xf32>
    %c0_11 = arith.constant 0 : index
    %c1 = arith.constant 1 : index
    %c0_12 = arith.constant 0 : index
    %c0_13 = arith.constant 0 : index
    %10 = vector.load %arg1[%c0_11, %c1, %c0_12, %c0_13] : memref<1x2x16x128xf32, #tpu.memory_space<vmem>>, vector<1x1x16x128xf32>
    %11 = vector.shape_cast %10 : vector<1x1x16x128xf32> to vector<16x128xf32>
    %12 = arith.addf %9, %11 : vector<16x128xf32>
    %cst = arith.constant dense<0.000000e+00> : vector<16x128xf32>
    %13 = tpu.matmul %0, %9, %cst {dimension_numbers = #tpu.dot_dimension_numbers<[1], [0], [0], [1], [0, 0, 1, 1], [], []>} : vector<16x16xf32>, vector<16x128xf32>, vector<16x128xf32> -> vector<16x128xf32>
    %cst_14 = arith.constant dense<0.000000e+00> : vector<16x128xf32>
    %14 = tpu.matmul %1, %11, %cst_14 {dimension_numbers = #tpu.dot_dimension_numbers<[1], [0], [0], [1], [0, 0, 1, 1], [], []>} : vector<16x16xf32>, vector<16x128xf32>, vector<16x128xf32> -> vector<16x128xf32>
    %cst_15 = arith.constant dense<0.000000e+00> : vector<16x128xf32>
    %15 = tpu.matmul %4, %12, %cst_15 {dimension_numbers = #tpu.dot_dimension_numbers<[1], [0], [0], [1], [0, 0, 1, 1], [], []>} : vector<16x16xf32>, vector<16x128xf32>, vector<16x128xf32> -> vector<16x128xf32>
    %16 = arith.subf %13, %14 : vector<16x128xf32>
    %17 = arith.subf %15, %13 : vector<16x128xf32>
    %18 = arith.subf %17, %14 : vector<16x128xf32>
    %19 = arith.addf %16, %18 : vector<16x128xf32>
    %cst_16 = arith.constant dense<0.000000e+00> : vector<16x128xf32>
    %20 = tpu.matmul %16, %2, %cst_16 {dimension_numbers = #tpu.dot_dimension_numbers<[1], [0], [0], [1], [0, 0, 1, 1], [], []>} : vector<16x128xf32>, vector<128x128xf32>, vector<16x128xf32> -> vector<16x128xf32>
    %cst_17 = arith.constant dense<0.000000e+00> : vector<16x128xf32>
    %21 = tpu.matmul %18, %3, %cst_17 {dimension_numbers = #tpu.dot_dimension_numbers<[1], [0], [0], [1], [0, 0, 1, 1], [], []>} : vector<16x128xf32>, vector<128x128xf32>, vector<16x128xf32> -> vector<16x128xf32>
    %cst_18 = arith.constant dense<0.000000e+00> : vector<16x128xf32>
    %22 = tpu.matmul %19, %5, %cst_18 {dimension_numbers = #tpu.dot_dimension_numbers<[1], [0], [0], [1], [0, 0, 1, 1], [], []>} : vector<16x128xf32>, vector<128x128xf32>, vector<16x128xf32> -> vector<16x128xf32>
    %23 = arith.subf %20, %21 : vector<16x128xf32>
    %24 = arith.subf %22, %20 : vector<16x128xf32>
    %25 = arith.subf %24, %21 : vector<16x128xf32>
    %c0_19 = arith.constant 0 : index
    %c0_20 = arith.constant 0 : index
    %c0_21 = arith.constant 0 : index
    %26 = vector.load %arg3[%c0_19, %c0_20, %c0_21] : memref<1x16x128xf32, #tpu.memory_space<vmem>>, vector<1x16x128xf32>
    %27 = vector.shape_cast %26 : vector<1x16x128xf32> to vector<16x128xf32>
    %c0_22 = arith.constant 0 : index
    %c0_23 = arith.constant 0 : index
    %c0_24 = arith.constant 0 : index
    %c0_25 = arith.constant 0 : index
    %28 = vector.load %arg2[%c0_22, %c0_23, %c0_24, %c0_25] : memref<1x2x16x128xf32, #tpu.memory_space<vmem>>, vector<1x1x16x128xf32>
    %29 = vector.shape_cast %28 : vector<1x1x16x128xf32> to vector<16x128xf32>
    %c0_26 = arith.constant 0 : index
    %c1_27 = arith.constant 1 : index
    %c0_28 = arith.constant 0 : index
    %c0_29 = arith.constant 0 : index
    %30 = vector.load %arg2[%c0_26, %c1_27, %c0_28, %c0_29] : memref<1x2x16x128xf32, #tpu.memory_space<vmem>>, vector<1x1x16x128xf32>
    %31 = vector.shape_cast %30 : vector<1x1x16x128xf32> to vector<16x128xf32>
    %32 = arith.subf %29, %23 : vector<16x128xf32>
    %33 = arith.mulf %27, %32 : vector<16x128xf32>
    %34 = arith.addf %23, %33 : vector<16x128xf32>
    %35 = arith.subf %31, %25 : vector<16x128xf32>
    %36 = arith.mulf %27, %35 : vector<16x128xf32>
    %37 = arith.addf %25, %36 : vector<16x128xf32>
    %38 = arith.addf %34, %37 : vector<16x128xf32>
    %cst_30 = arith.constant dense<0.000000e+00> : vector<16x128xf32>
    %39 = tpu.matmul %0, %34, %cst_30 {dimension_numbers = #tpu.dot_dimension_numbers<[1], [0], [0], [1], [0, 0, 1, 1], [], []>} : vector<16x16xf32>, vector<16x128xf32>, vector<16x128xf32> -> vector<16x128xf32>
    %cst_31 = arith.constant dense<0.000000e+00> : vector<16x128xf32>
    %40 = tpu.matmul %1, %37, %cst_31 {dimension_numbers = #tpu.dot_dimension_numbers<[1], [0], [0], [1], [0, 0, 1, 1], [], []>} : vector<16x16xf32>, vector<16x128xf32>, vector<16x128xf32> -> vector<16x128xf32>
    %cst_32 = arith.constant dense<0.000000e+00> : vector<16x128xf32>
    %41 = tpu.matmul %6, %38, %cst_32 {dimension_numbers = #tpu.dot_dimension_numbers<[1], [0], [0], [1], [0, 0, 1, 1], [], []>} : vector<16x16xf32>, vector<16x128xf32>, vector<16x128xf32> -> vector<16x128xf32>
    %42 = arith.addf %39, %40 : vector<16x128xf32>
    %43 = arith.subf %41, %39 : vector<16x128xf32>
    %44 = arith.addf %43, %40 : vector<16x128xf32>
    %45 = arith.addf %42, %44 : vector<16x128xf32>
    %cst_33 = arith.constant dense<0.000000e+00> : vector<16x128xf32>
    %46 = tpu.matmul %42, %2, %cst_33 {dimension_numbers = #tpu.dot_dimension_numbers<[1], [0], [0], [1], [0, 0, 1, 1], [], []>} : vector<16x128xf32>, vector<128x128xf32>, vector<16x128xf32> -> vector<16x128xf32>
    %cst_34 = arith.constant dense<0.000000e+00> : vector<16x128xf32>
    %47 = tpu.matmul %44, %3, %cst_34 {dimension_numbers = #tpu.dot_dimension_numbers<[1], [0], [0], [1], [0, 0, 1, 1], [], []>} : vector<16x128xf32>, vector<128x128xf32>, vector<16x128xf32> -> vector<16x128xf32>
    %cst_35 = arith.constant dense<0.000000e+00> : vector<16x128xf32>
    %48 = tpu.matmul %45, %7, %cst_35 {dimension_numbers = #tpu.dot_dimension_numbers<[1], [0], [0], [1], [0, 0, 1, 1], [], []>} : vector<16x128xf32>, vector<128x128xf32>, vector<16x128xf32> -> vector<16x128xf32>
    %49 = arith.addf %46, %47 : vector<16x128xf32>
    %50 = arith.subf %48, %46 : vector<16x128xf32>
    %51 = arith.addf %50, %47 : vector<16x128xf32>
    %c0_36 = arith.constant 0 : index
    %c0_37 = arith.constant 0 : index
    %c0_38 = arith.constant 0 : index
    %c0_39 = arith.constant 0 : index
    %52 = vector.load %arg8[%c0_36, %c0_37, %c0_38, %c0_39] : memref<1x2x16x128xf32, #tpu.memory_space<vmem>>, vector<1x1x16x128xf32>
    %53 = vector.shape_cast %52 : vector<1x1x16x128xf32> to vector<16x128xf32>
    %54 = vector.shape_cast %49 : vector<16x128xf32> to vector<1x1x16x128xf32>
    tpu.vector_store %arg8[%c0_36, %c0_37, %c0_38, %c0_39], %54 {strides = array<i32>} : memref<1x2x16x128xf32, #tpu.memory_space<vmem>>, vector<1x1x16x128xf32>,
    %c0_40 = arith.constant 0 : index
    %c1_41 = arith.constant 1 : index
    %c0_42 = arith.constant 0 : index
    %c0_43 = arith.constant 0 : index
    %55 = vector.load %arg8[%c0_40, %c1_41, %c0_42, %c0_43] : memref<1x2x16x128xf32, #tpu.memory_space<vmem>>, vector<1x1x16x128xf32>
    %56 = vector.shape_cast %55 : vector<1x1x16x128xf32> to vector<16x128xf32>
    %57 = vector.shape_cast %51 : vector<16x128xf32> to vector<1x1x16x128xf32>
    tpu.vector_store %arg8[%c0_40, %c1_41, %c0_42, %c0_43], %57 {strides = array<i32>} : memref<1x2x16x128xf32, #tpu.memory_space<vmem>>, vector<1x1x16x128xf32>,
    return
  }
  func.func @transform_0(%arg0: i32) -> (i32, i32, i32, i32) {
    %c0_i32 = arith.constant 0 : i32
    %c0_i32_0 = arith.constant 0 : i32
    %c0_i32_1 = arith.constant 0 : i32
    %c0_i32_2 = arith.constant 0 : i32
    return %arg0, %c0_i32, %c0_i32_0, %c0_i32_1 : i32, i32, i32, i32
  }
  func.func @transform_1(%arg0: i32) -> (i32, i32, i32, i32) {
    %c0_i32 = arith.constant 0 : i32
    %c0_i32_0 = arith.constant 0 : i32
    %c0_i32_1 = arith.constant 0 : i32
    %c0_i32_2 = arith.constant 0 : i32
    return %arg0, %c0_i32, %c0_i32_0, %c0_i32_1 : i32, i32, i32, i32
  }
  func.func @transform_2(%arg0: i32) -> (i32, i32, i32) {
    %c0_i32 = arith.constant 0 : i32
    %c0_i32_0 = arith.constant 0 : i32
    %c0_i32_1 = arith.constant 0 : i32
    return %arg0, %c0_i32, %c0_i32_0 : i32, i32, i32
  }
  func.func @transform_3(%arg0: i32) -> (i32, i32) {
    %c0_i32 = arith.constant 0 : i32
    %c0_i32_0 = arith.constant 0 : i32
    %c0_i32_1 = arith.constant 0 : i32
    return %c0_i32, %c0_i32_0 : i32, i32
  }
  func.func @transform_4(%arg0: i32) -> (i32, i32) {
    %c0_i32 = arith.constant 0 : i32
    %c0_i32_0 = arith.constant 0 : i32
    %c0_i32_1 = arith.constant 0 : i32
    return %c0_i32, %c0_i32_0 : i32, i32
  }
  func.func @transform_5(%arg0: i32) -> (i32, i32) {
    %c0_i32 = arith.constant 0 : i32
    %c0_i32_0 = arith.constant 0 : i32
    %c0_i32_1 = arith.constant 0 : i32
    return %c0_i32, %c0_i32_0 : i32, i32
  }
  func.func @transform_6(%arg0: i32) -> (i32, i32) {
    %c0_i32 = arith.constant 0 : i32
    %c0_i32_0 = arith.constant 0 : i32
    %c0_i32_1 = arith.constant 0 : i32
    return %c0_i32, %c0_i32_0 : i32, i32
  }
  func.func @transform_7(%arg0: i32) -> (i32, i32, i32, i32) {
    %c0_i32 = arith.constant 0 : i32
    %c0_i32_0 = arith.constant 0 : i32
    %c0_i32_1 = arith.constant 0 : i32
    %c0_i32_2 = arith.constant 0 : i32
    return %arg0, %c0_i32, %c0_i32_0, %c0_i32_1 : i32, i32, i32, i32
  }
}

</mosaic_0001>

<bundles_post_ra>
// kernel: tpu_custom_call.1
= control target key start
LH: loop header
LB: loop body
LE: loop exit
PB: predicated region body
PF: predicated region fallthrough
CT: control target
= control target key end

     0   :  { %s3434_s0 = inlined_call_operand.hbm [shape: f32[2,2,16,128], index: 0, kind: input, shape index: {}]   ;;  %s3435_s1 = inlined_call_operand.hbm [shape: f32[2,2,16,128], index: 1, kind: input, shape index: {}]   ;;  %s3436_s2 = inlined_call_operand.hbm [shape: f32[2,16,128], index: 2, kind: input, shape index: {}]   ;;  %s3437_s3 = inlined_call_operand.hbm [shape: f32[16,16], index: 3, kind: input, shape index: {}]   ;;  %s3438_s4 = inlined_call_operand.hbm [shape: f32[16,16], index: 4, kind: input, shape index: {}]   ;;  %s3439_s5 = inlined_call_operand.hbm [shape: f32[128,128], index: 5, kind: input, shape index: {}]   ;;  %s3440_s6 = inlined_call_operand.hbm [shape: f32[128,128], index: 6, kind: input, shape index: {}]   ;;  %s3441_s7 = inlined_call_operand.hbm [shape: f32[2,2,16,128], index: 7, kind: output, shape index: {}]  }
   0x1   :  { %3474 = sst [smem:[#allocation34_spill]] %s3435_s1 }
   0x2   :  { %3475 = sst [smem:[#allocation35_spill]] %s3437_s3 }
   0x3   :  { %3476 = sst [smem:[#allocation36_spill]] %s3439_s5 }
   0x4   :  { %12 = vsyncpa [#allocation3], 0 }
   0x5   :  { %14 = vsyncpa [#allocation3 + $0x1], 0 }
   0x6   :  { %15 = vsyncpa [#allocation6], 0 }
   0x7   :  { %17 = vsyncpa [#allocation6 + $0x1], 0 }
   0x8   :  { %18 = vsyncpa [#allocation9], 0 }
   0x9   :  { %19 = vsyncpa [#allocation12], 0 }
   0xa   :  { %20 = vsyncpa [#allocation4], 0 }
   0xb   :  { %22 = vsyncpa [#allocation4 + $0x1], 0  ;;  %s2745_s24 = smov 0   ;;  %s2747_s25 = smov 0  }
   0xc   :  { %s2749_s26 = smov 0   ;;  %s2751_s27 = smov 0  }
   0xd LB: > { %3477 = sst [smem:[#allocation20_spill]] %s2679_s24  ;;  %s2766_s28 = sadd.s32 4294967295, %s2691_s27   ;;  %s2691_s27 = sphi %s2751_s27, %s3531_s27   ;;  %s2687_s26 = sphi %s2749_s26, %s3533_s26   ;;  %s2683_s25 = sphi %s2747_s25, %s3535_s25   ;;  %s2679_s24 = sphi %s2745_s24, %s3534_s24  }
   0xe   : > { %3478 = sst [smem:[#allocation21_spill]] %s2687_s26  ;;  %s1658_s29 = sadd.s32 4294967294, %s2691_s27  }
   0xf   : > { %p48_p0 = scmp.ne.s32.totalorder %s2683_s25, %s2679_s24  ;;  %p3442_p1 = scmp.eq.s32.totalorder %s2766_s28, 0 }
  0x10   : > { %p214_p3 = scmp.eq.s32.totalorder %s1658_s29, 1  ;;  %p1659_p5 = scmp.ge.s32.totalorder %s2691_s27, 1 }
  0x11   : > { %p2775_p4 = por %p3442_p1, %p48_p0  ;;  %p221_p7 = scmp.lt.s32.totalorder %s2691_s27, 3 }
  0x12   : > { %p2780_p6 = por %p214_p3, %p48_p0  ;;  %s2693_s10 = smov [#allocation8]  }
  0x13   : > { %s3479_s30 = scalar_select %p2775_p4, 1, 0 }
  0x14   : > { %s3480_s8 = scalar_select %p2780_p6, 1, 0 }
  0x15   : > { %p2785_p8 = pnand %p1659_p5, %p221_p7  ;;  %s233_s11 = sshll.u32 %s2693_s10, 4  ;;  %s2789_s11 = int_to_ptr.vmem [resolvable:$true] %s233_s11 }
  0x16   : > { %3481 = sst [smem:[#allocation22_spill]] %s3480_s8  ;;  %s2694_s13 = smov [#allocation11]  }
  0x17   : > { %s3482_s9 = scalar_select %p2785_p8, 1, 0 }
  0x18   : > { %p2334_p9 = pneg %p2785_p8  ;;  %s259_s14 = sshll.u32 %s2694_s13, 4  ;;  %s2800_s14 = int_to_ptr.vmem [resolvable:$true] %s259_s14 }
  0x19   : > { %s3484_s3 = sld [smem:[#allocation35_spill]] }
  0x1a   : > { %p2796_p11 = pnand %p2334_p9, %p3442_p1 }
  0x1c   : > { %s3483_s12 = scalar_select %p2796_p11, 1, 0 }
  0x1d   : > { %p2810_p13 = pneg %p2796_p11 }
  0x1f   : > { %s2411_s17 = scalar_lea.hbm %s3484_s3, 256 }
  0x20   : > { %p2412_p12 = scmp.ne.s32.totalorder %s3484_s3, %s2411_s17  ;;  %p2418_p5 = scmp.lt.u32.totalorder %s2411_s17, %s3484_s3 }
  0x21   : > { %s3485_s20 = scalar_select %p2810_p13, 1, 0 }
  0x22   : > { %p2414_p0 = pnand %p2810_p13, %p2412_p12 }
  0x24   : > { %p2415_p3 = pneg %p2414_p0 }
  0x26   : > { %p2420_p7 = pnand %p2418_p5, %p2415_p3 }
  0x28   : > { %2423 = shalt.err (!%p2420_p7)
}
  0x29   : > { %s2424_s23 = scalar_lea.vmem %s2789_s11, 256  ;;  %p2432_p2 = scmp.lt.s32.totalorder %s2789_s11, %s2789_s11 }
  0x2a   : > { %p2425_p9 = scmp.ne.s32.totalorder %s2789_s11, %s2424_s23  ;;  %p2433_p6 = scmp.lt.s32.totalorder %s2424_s23, %s2424_s23 }
  0x2c   : > { %p2427_p10 = pnand %p2425_p9, %p2810_p13  ;;  %p2434_p12 = por %p2433_p6, %p2432_p2 }
  0x2e   : > { %p2428_p1 = pneg %p2427_p10 }
  0x30   : > { %p2435_p0 = pnand %p2434_p12, %p2428_p1 }
  0x32   : > { %2438 = shalt.err (!%p2435_p0)
}
  0x33   : > { %s3443_s29 = smov 128   ;;  %s3445_s10 = smov 8  }
  0x34   : > { %2337 = dma.hbm_to_vmem [thread:$0]  (!%p2796_p11), %s3484_s3, 256, %s2789_s11, [#allocation9], %s3443_s29, %s3443_s29, %s3445_s10  }
  0x35   : > { %s3486_s5 = sld [smem:[#allocation36_spill]] }
  0x3b   : > { %s2439_s18 = scalar_lea.hbm %s3486_s5, 2048 }
  0x3c   : > { %p2440_p1 = scmp.ne.s32.totalorder %s3486_s5, %s2439_s18  ;;  %p2446_p10 = scmp.lt.u32.totalorder %s2439_s18, %s3486_s5 }
  0x3e   : > { %p2442_p2 = pnand %p2440_p1, %p2810_p13 }
  0x40   : > { %p2443_p6 = pneg %p2442_p2 }
  0x42   : > { %p2448_p3 = pnand %p2446_p10, %p2443_p6 }
  0x44   : > { %2451 = shalt.err (!%p2448_p3)
}
  0x45   : > { %s2452_s11 = scalar_lea.vmem %s2800_s14, 2048  ;;  %p2460_p12 = scmp.lt.s32.totalorder %s2800_s14, %s2800_s14 }
  0x46   : > { %p2453_p5 = scmp.ne.s32.totalorder %s2800_s14, %s2452_s11  ;;  %p2461_p0 = scmp.lt.s32.totalorder %s2452_s11, %s2452_s11 }
  0x48   : > { %p2455_p7 = pnand %p2453_p5, %p2810_p13  ;;  %p2462_p1 = por %p2461_p0, %p2460_p12 }
  0x4a   : > { %p2456_p9 = pneg %p2455_p7 }
  0x4c   : > { %p2463_p2 = pnand %p2462_p1, %p2456_p9 }
  0x4e   : > { %2466 = shalt.err (!%p2463_p2)
}
  0x4f   : > { %2343 = dma.hbm_to_vmem [thread:$0]  (!%p2796_p11), %s3486_s5, 2048, %s2800_s14, [#allocation12], %s3443_s29, %s3443_s29, %s3445_s10  }
  0x50   : > { %s2861_s16 = sadd.s32 1, %s2691_s27   ;;  %s35_s17 = sadd.s32 1, %s2687_s26 }
  0x51   : > { %3487 = sst [smem:[#allocation23_spill]] %s2861_s16  ;;  %s32_s18 = ssub.s32 %s2691_s27, %s2861_s16 }
  0x52   : > { %p42_p6 = scmp.ne.s32.totalorder %s2687_s26, %s2683_s25  ;;  %p33_p10 = scmp.eq.s32.totalorder %s32_s18, 0 }
  0x53   : > { %p43_p3 = scmp.eq.s32.totalorder %s2691_s27, 0  ;;  %p3488_p5 = scmp.eq.s32.totalorder %s2766_s28, 1 }
  0x54   : > { %p2365_p9 = scmp.lt.s32.totalorder %s2691_s27, 2  ;;  %s2880_s22 = sand.u32 1, %s2687_s26  }
  0x55   : > { %p2871_p7 = por %p3488_p5, %p42_p6  ;;  %p44_p12 = por %p43_p3, %p42_p6 }
  0x56   : > { %s2877_s21 = scalar_select %p33_p10, %s2687_s26, %s35_s17  }
  0x57   : > { %s3489_s19 = scalar_select %p2871_p7, 1, 0 }
  0x58   : > { %3490 = sst [smem:[#allocation24_spill]] %s2877_s21  ;;  %s3448_s14 = sshll.u32 %s2880_s22, 5 }
  0x59   : > { %s3449_s23 = sshll.u32 %s2691_s27, 9  ;;  %p2884_p0 = pnand %p2365_p9, %p44_p12 }
  0x5a   : > { %s307_s13 = sand.u32 1, %s2691_s27   ;;  %s3492_s1 = sld [smem:[#allocation34_spill]] }
  0x5b   : > { %s3491_s11 = scalar_select %p2884_p0, 1, 0 }
  0x5c   : > { %s311_s17 = scalar_lea.vmem [#allocation5], %s3448_s14  ;;  %s2697_s3 = smov [#allocation10]  }
  0x5d   : > { %s318_s10 = sshll.u32 %s311_s17, 4  ;;  %s2900_s5 = sshll.u32 %s2697_s3, 4  ;;  %s2898_s10 = int_to_ptr.vmem [resolvable:$true] %s318_s10  ;;  %s247_s5 = int_to_ptr.vmem [resolvable:$true] %s2900_s5 }
  0x5e   : > { %s2902_s21 = scalar_lea.sflag [#allocation6], %s307_s13  ;;  %p2908_p2 = pneg %p2884_p0 }
  0x60   : > { %s2894_s29 = scalar_lea.hbm %s3492_s1, %s3449_s23  ;;  %s2472_s14 = scalar_lea.hbm %s3492_s1, 1024 }
  0x61   : > { %s2467_s26 = scalar_lea.hbm %s2894_s29, 512  ;;  %p2473_p3 = scmp.lt.u32.totalorder %s2894_s29, %s3492_s1 }
  0x62   : > { %p2468_p1 = scmp.ne.s32.totalorder %s2894_s29, %s2467_s26  ;;  %p2474_p5 = scmp.lt.u32.totalorder %s2472_s14, %s2467_s26 }
  0x63   : > { %s3493_s15 = scalar_select %p2908_p2, 1, 0 }
  0x64   : > { %p2470_p6 = pnand %p2908_p2, %p2468_p1  ;;  %p2475_p9 = por %p2474_p5, %p2473_p3 }
  0x65   : > { %p2476_p12 = scmp.lt.u32.totalorder %s2467_s26, %s2894_s29 }
  0x66   : > { %p2471_p10 = pneg %p2470_p6 }
  0x67   : > { %p2477_p7 = por %p2476_p12, %p2475_p9 }
  0x69   : > { %p2478_p4 = pnand %p2477_p7, %p2471_p10 }
  0x6b   : > { %2481 = shalt.err (!%p2478_p4)
}
  0x6c   : > { %s2482_s13 = scalar_lea.vmem %s2898_s10, 512  ;;  %s2698_s18 = smov [#allocation5]  }
  0x6d   : > { %p2483_p1 = scmp.ne.s32.totalorder %s2898_s10, %s2482_s13  ;;  %s2487_s17 = sshll.u32 %s2698_s18, 4  ;;  %s2488_s17 = int_to_ptr.vmem [resolvable:$false] %s2487_s17 }
  0x6e   : > { %s2489_s23 = scalar_lea.vmem %s2488_s17, 1024  ;;  %p2490_p11 = scmp.lt.s32.totalorder %s2898_s10, %s2488_s17 }
  0x6f   : > { %p2485_p6 = pnand %p2483_p1, %p2908_p2  ;;  %p2491_p13 = scmp.lt.s32.totalorder %s2489_s23, %s2482_s13 }
  0x71   : > { %p2486_p8 = pneg %p2485_p6  ;;  %p2492_p3 = por %p2491_p13, %p2490_p11 }
  0x73   : > { %p2493_p5 = pnand %p2492_p3, %p2486_p8 }
  0x75   : > { %2496 = shalt.err (!%p2493_p5)
}
  0x76   : > { %s3494_s26 = smov 8   ;;  %s3495_s14 = smov 128  }
  0x77   : > { %2353 = dma.hbm_to_vmem [thread:$0]  (!%p2884_p0), %s2894_s29, 512, %s2898_s10, %s2902_s21, %s3495_s14, %s3495_s14, %s3494_s26  }
  0x78   : > { %s2497_s17 = scalar_lea.hbm %s3438_s4, 256  ;;  %p3496_p8 = scmp.ne.s32.totalorder %s3485_s20, 0 }
  0x79   : > { %p2498_p4 = scmp.ne.s32.totalorder %s3438_s4, %s2497_s17  ;;  %p2504_p7 = scmp.lt.u32.totalorder %s2497_s17, %s3438_s4 }
  0x7b   : > { %p2500_p11 = pnand %p2498_p4, %p3496_p8 }
  0x7d   : > { %p2501_p13 = pneg %p2500_p11 }
  0x7f   : > { %p2506_p10 = pnand %p2504_p7, %p2501_p13 }
  0x81   : > { %2509 = shalt.err (!%p2506_p10)
}
  0x82   : > { %s2510_s8 = scalar_lea.vmem %s247_s5, 256  ;;  %p2518_p6 = scmp.lt.s32.totalorder %s247_s5, %s247_s5 }
  0x83   : > { %p2511_p9 = scmp.ne.s32.totalorder %s247_s5, %s2510_s8  ;;  %p2519_p3 = scmp.lt.s32.totalorder %s2510_s8, %s2510_s8 }
  0x85   : > { %p2513_p12 = pnand %p2511_p9, %p3496_p8  ;;  %p2520_p5 = por %p2519_p3, %p2518_p6 }
  0x87   : > { %p2514_p1 = pneg %p2513_p12 }
  0x89   : > { %p2521_p0 = pnand %p2520_p5, %p2514_p1 }
  0x8b   : > { %2524 = shalt.err (!%p2521_p0)
}
  0x8c   : > { %p3497_p4 = scmp.ne.s32.totalorder %s3483_s12, 0  ;;  %s2699_s10 = smov [#allocation13]  }
  0x8d   : > { %s272_s16 = sshll.u32 %s2699_s10, 4  ;;  %s2525_s8 = scalar_lea.hbm %s3440_s6, 2048  ;;  %s273_s16 = int_to_ptr.vmem [resolvable:$true] %s272_s16 }
  0x8e   : > { %2340 = dma.hbm_to_vmem [thread:$0]  (!%p3497_p4), %s3438_s4, 256, %s247_s5, [#allocation9], %s3495_s14, %s3495_s14, %s3494_s26  }
  0x8f   : > { %p2526_p0 = scmp.ne.s32.totalorder %s3440_s6, %s2525_s8  ;;  %p2532_p7 = scmp.lt.u32.totalorder %s2525_s8, %s3440_s6 }
  0x91   : > { %p2528_p11 = pnand %p2526_p0, %p3496_p8 }
  0x93   : > { %p2529_p13 = pneg %p2528_p11 }
  0x95   : > { %p2534_p10 = pnand %p2532_p7, %p2529_p13 }
  0x97   : > { %2537 = shalt.err (!%p2534_p10)
}
  0x98   : > { %s2538_s5 = scalar_lea.vmem %s273_s16, 2048  ;;  %p2546_p6 = scmp.lt.s32.totalorder %s273_s16, %s273_s16 }
  0x99   : > { %p2539_p9 = scmp.ne.s32.totalorder %s273_s16, %s2538_s5  ;;  %p2547_p3 = scmp.lt.s32.totalorder %s2538_s5, %s2538_s5 }
  0x9b   : > { %p2541_p12 = pnand %p2539_p9, %p3496_p8  ;;  %p2548_p5 = por %p2547_p3, %p2546_p6 }
  0x9d   : > { %p2542_p1 = pneg %p2541_p12 }
  0x9f   : > { %p2549_p2 = pnand %p2548_p5, %p2542_p1 }
  0xa1   : > { %2552 = shalt.err (!%p2549_p2)
}
  0xa2   : > { %2346 = dma.hbm_to_vmem [thread:$0]  (!%p3497_p4), %s3440_s6, 2048, %s273_s16, [#allocation12], %s3495_s14, %s3495_s14, %s3494_s26  }
  0xa3   : > { %s3498_s20 = sshll.u32 %s2691_s27, 9  ;;  %s3499_s18 = sshll.u32 %s2880_s22, 5 }
  0xa4   : > { %s2983_s3 = scalar_lea.hbm %s3434_s0, %s3498_s20  ;;  %s290_s12 = scalar_lea.vmem [#allocation2], %s3499_s18 }
  0xa5   : > { %s297_s8 = sshll.u32 %s290_s12, 4  ;;  %s1671_s17 = sshll.u32 %s2880_s22, 4  ;;  %s2987_s8 = int_to_ptr.vmem [resolvable:$true] %s297_s8 }
  0xa6   : > { %s287_s13 = scalar_lea.sflag [#allocation3], %s2880_s22  ;;  %s2553_s23 = scalar_lea.hbm %s2983_s3, 512 }
  0xa7   : > { %p2554_p2 = scmp.ne.s32.totalorder %s2983_s3, %s2553_s23  ;;  %p3500_p8 = scmp.ne.s32.totalorder %s3493_s15, 0 }
  0xa8   : > { %s2558_s24 = scalar_lea.hbm %s3434_s0, 1024  ;;  %p2559_p11 = scmp.lt.u32.totalorder %s2983_s3, %s3434_s0 }
  0xa9   : > { %p2556_p4 = pnand %p2554_p2, %p3500_p8  ;;  %p2560_p13 = scmp.lt.u32.totalorder %s2558_s24, %s2553_s23 }
  0xaa   : > { %p2562_p10 = scmp.lt.u32.totalorder %s2553_s23, %s2983_s3 }
  0xab   : > { %p2557_p0 = pneg %p2556_p4  ;;  %p2561_p7 = por %p2560_p13, %p2559_p11 }
  0xad   : > { %p2563_p9 = por %p2562_p10, %p2561_p7 }
  0xaf   : > { %p2564_p12 = pnand %p2563_p9, %p2557_p0 }
  0xb1   : > { %2567 = shalt.err (!%p2564_p12)
}
  0xb2   : > { %s2568_s29 = scalar_lea.vmem %s2987_s8, 512  ;;  %s2700_s10 = smov [#allocation2]  }
  0xb3   : > { %p2569_p1 = scmp.ne.s32.totalorder %s2987_s8, %s2568_s29  ;;  %s2573_s18 = sshll.u32 %s2700_s10, 4  ;;  %s2574_s18 = int_to_ptr.vmem [resolvable:$false] %s2573_s18 }
  0xb4   : > { %s2575_s12 = scalar_lea.vmem %s2574_s18, 1024  ;;  %p2576_p5 = scmp.lt.s32.totalorder %s2987_s8, %s2574_s18 }
  0xb5   : > { %p2571_p6 = pnand %p2569_p1, %p3500_p8  ;;  %p2577_p2 = scmp.lt.s32.totalorder %s2575_s12, %s2568_s29 }
  0xb7   : > { %p2572_p3 = pneg %p2571_p6  ;;  %p2578_p4 = por %p2577_p2, %p2576_p5 }
  0xb9   : > { %p2579_p11 = pnand %p2578_p4, %p2572_p3 }
  0xbb   : > { %2582 = shalt.err (!%p2579_p11)
}
  0xbc   : > { %p3501_p0 = scmp.ne.s32.totalorder %s3491_s11, 0  ;;  %s1708_s23 = sshll.u32 %s2691_s27, 8 }
  0xbd   : > { %s3021_s24 = scalar_lea.hbm %s3436_s2, %s1708_s23  ;;  %s332_s1 = scalar_lea.vmem [#allocation7], %s1671_s17 }
  0xbe   : > { %2350 = dma.hbm_to_vmem [thread:$0]  (!%p3501_p0), %s2983_s3, 512, %s2987_s8, %s287_s13, %s3495_s14, %s3495_s14, %s3494_s26  }
  0xbf   : > { %s339_s20 = sshll.u32 %s332_s1, 4  ;;  %s2583_s29 = scalar_lea.hbm %s3021_s24, 256  ;;  %s3025_s20 = int_to_ptr.vmem [resolvable:$true] %s339_s20 }
  0xc0   : > { %p2584_p13 = scmp.ne.s32.totalorder %s3021_s24, %s2583_s29  ;;  %s2588_s13 = scalar_lea.hbm %s3436_s2, 512 }
  0xc1   : > { %p2589_p9 = scmp.lt.u32.totalorder %s3021_s24, %s3436_s2  ;;  %p2590_p12 = scmp.lt.u32.totalorder %s2588_s13, %s2583_s29 }
  0xc2   : > { %p2586_p7 = pnand %p2584_p13, %p3500_p8  ;;  %p2592_p6 = scmp.lt.u32.totalorder %s2583_s29, %s3021_s24 }
  0xc3   : > { %p2591_p1 = por %p2590_p12, %p2589_p9 }
  0xc4   : > { %p2587_p10 = pneg %p2586_p7 }
  0xc5   : > { %p2593_p3 = por %p2592_p6, %p2591_p1 }
  0xc7   : > { %p2594_p5 = pnand %p2593_p3, %p2587_p10 }
  0xc9   : > { %2597 = shalt.err (!%p2594_p5)
}
  0xca   : > { %s2598_s22 = scalar_lea.vmem %s3025_s20, 256  ;;  %s2701_s17 = smov [#allocation7]  }
  0xcb   : > { %p2599_p2 = scmp.ne.s32.totalorder %s3025_s20, %s2598_s22  ;;  %s2603_s12 = sshll.u32 %s2701_s17, 4  ;;  %s2604_s12 = int_to_ptr.vmem [resolvable:$false] %s2603_s12 }
  0xcc   : > { %s2605_s23 = scalar_lea.vmem %s2604_s12, 512  ;;  %p2606_p13 = scmp.lt.s32.totalorder %s3025_s20, %s2604_s12 }
  0xcd   : > { %p2601_p4 = pnand %p2599_p2, %p3500_p8  ;;  %p2607_p7 = scmp.lt.s32.totalorder %s2605_s23, %s2598_s22 }
  0xcf   : > { %p2602_p11 = pneg %p2601_p4  ;;  %p2608_p9 = por %p2607_p7, %p2606_p13 }
  0xd1   : > { %p2609_p12 = pnand %p2608_p9, %p2602_p11 }
  0xd3   : > { %2612 = shalt.err (!%p2609_p12)
}
  0xd4   : > { %2356 = dma.hbm_to_vmem [thread:$0]  (!%p3501_p0), %s3021_s24, 256, %s3025_s20, %s2902_s21, %s3495_s14, %s3495_s14, %s3494_s26  }
  0xd5   : > { %p3502_p8 = scmp.ne.s32.totalorder %s3482_s9, 0 }
  0xd7   : > { %351 = sbr.rel (%p3502_p8) target bundleno = 1203 (0x4b3), region = 48 }
  0xde   : > { %s3055_s15 = sand.u32 1, %s2683_s25   ;;  %p3503_p10 = scmp.ne.s32.totalorder %s3479_s30, 0 }
  0xdf   : > { %s3058_s16 = sshll.u32 %s3055_s15, 5  ;;  %s354_s11 = scalar_lea.sflag [#allocation3], %s3055_s15 }
  0xe0   : > { %s357_s5 = scalar_lea.vmem [#allocation2], %s3058_s16 }
  0xe1   : > { %2658 = dma.done.wait (%p3503_p10), %s354_s11, 512  }
  0xe2   : > { %2660 = vsyncadd (%p3503_p10), %s354_s11, 4294966784  ;;  %s362_s9 = sand.u32 1, %s2766_s28   ;;  %s3068_s26 = scalar_lea.vmem [#allocation5], %s3058_s16 }
  0xe3   : > { %s363_s21 = scalar_lea.sflag [#allocation6], %s362_s9 }
  0xe4   : > { %2662 = dma.done.wait (%p3503_p10), %s363_s21, 768  }
  0xe5   : > { %2664 = vsyncadd (%p3503_p10), %s363_s21, 4294966528  ;;  %s1677_s14 = sshll.u32 %s3055_s15, 4  ;;  %p3504_p0 = scmp.eq.s32.totalorder %s2766_s28, 0 }
  0xe6   : > { %s3075_s24 = scalar_lea.vmem [#allocation7], %s1677_s14 }
  0xe7   : > { %2666 = dma.done.wait (%p3504_p0), [#allocation9], 512   ;;  %p3505_p1 = pmov %p3504_p0 }
  0xe8   : > { %p3506_p6 = pmov %p3504_p0 }
  0xe9   : > { %2668 = vsyncadd (%p3505_p1), [#allocation9], 4294966784 }
  0xea   : > { %2670 = dma.done.wait (%p3506_p6), [#allocation12], 4096   ;;  %p3507_p3 = pmov %p3504_p0 }
  0xeb   : > { %vm511_vm0 = vcmask 130048   ;;  %v504_v0 = vld [vmem:[%s357_s5] sm:$0xff]  ;;  %v505_v1 = vld [vmem:[%s357_s5 + $0x8] sm:$0xff]  ;;  %v1683_v2 = vld [vmem:[%s357_s5 + $0x10] sm:$0xff]  ;;  %s431_s30 = scalar_lea.vmem [#allocation14], %s3058_s16  ;;  %s1709_s20 = sshll.u32 %s2766_s28, 9 }
  0xec   : > { %2672 = vsyncadd (%p3507_p3), [#allocation12], 4294963200  ;;  %v1684_v3 = vld [vmem:[%s357_s5 + $0x18] sm:$0xff]  ;;  %v509_v4 = vadd.f32 %v1683_v2, %v504_v0  ;;  %v2094_v5 = vpack.c.bf16 %v505_v1, %v504_v0  ;;  %v3085_v6 = vld [vmem:[#allocation8] sm:$0xff]  ;;  %s1504_s1 = sshll.u32 %s431_s30, 4  ;;  %s3390_s8 = scalar_lea.hbm %s3441_s7, %s1709_s20  ;;  %s3385_s1 = int_to_ptr.vmem [resolvable:$true] %s1504_s1 }
  0xed   : > { %v510_v7 = vadd.f32 %v1684_v3, %v505_v1  ;;  %1846 = vmatprep.mubr.msk.f32.mxu1 %vm511_vm0, %v3085_v6  ;;  %v2098_v8 = vpack.c.bf16 %v1684_v3, %v1683_v2  ;;  %v3089_v9 = vld [vmem:[#allocation8 + $0x8] sm:$0xff]  ;;  %v3091_v10 = vld [vmem:[#allocation13] sm:$0xff]  ;;  %v3095_v12 = vld [vmem:[#allocation10] sm:$0xff]  ;;  %s1491_s13 = scalar_lea.sflag [#allocation4], %s3055_s15  ;;  %s2613_s10 = scalar_lea.vmem %s3385_s1, 512 }
  0xee   : > { %2095 = vmatprep.subr.bf16.mxu1 %v2094_v5  ;;  %v3093_v11 = vld [vmem:[#allocation13 + $0x8] sm:$0xff]  ;;  %v3101_v15 = vld [vmem:[#allocation13 + $0x10] sm:$0xff]  ;;  %v3103_v16 = vld [vmem:[#allocation13 + $0x18] sm:$0xff]  ;;  %v468_v23 = vadd.f32 %v3095_v12, %v3085_v6  ;;  %p2614_p5 = scmp.ne.s32.totalorder %s3385_s1, %s2613_s10  ;;  %p3526_p2 = scmp.ne.s32.totalorder %s3489_s19, 0 }
  0xef   : > { %2097 = vmatpush3.bf16.msra.mxu1 %v2094_v5  ;;  %3508 = vst [vmem:[#allocation25_spill] sm:$0xff] %v3093_v11  ;;  %v2102_v13 = vpack.c.bf16 %v510_v7, %v509_v4  ;;  %v3099_v14 = vpack.c.bf16 %v3093_v11, %v3091_v10  ;;  %3509 = vst [vmem:[#allocation26_spill] sm:$0xff] %v3101_v15  ;;  %v3105_v17 = vld [vmem:[#allocation11] sm:$0xff]  ;;  %v3107_v18 = vld [vmem:[#allocation11 + $0x8] sm:$0xff]  ;;  %v3111_v19 = vpack.c.bf16 %v3103_v16, %v3101_v15  ;;  %s2702_s28 = smov [#allocation14]  }
  0xf0   : > { %2099 = vmatprep.subr.bf16.mxu1 %v2098_v8  ;;  %3510 = vst [vmem:[#allocation27_spill] sm:$0xff] %v3103_v16  ;;  %3511 = vst [vmem:[#allocation28_spill] sm:$0xff] %v3105_v17  ;;  %v3116_v20 = vld [vmem:[#allocation13 + $0x20] sm:$0xff]  ;;  %v3118_v21 = vld [vmem:[#allocation13 + $0x28] sm:$0xff]  ;;  %v3128_v24 = vpack.c.bf16 %v3107_v18, %v3105_v17  ;;  %v470_v59 = vadd.f32 %v3091_v10, %v3105_v17  ;;  %v471_v60 = vadd.f32 %v3093_v11, %v3107_v18  ;;  %p2615_p4 = pnand %p2614_p5, %p3526_p2  ;;  %s2617_s18 = sshll.u32 %s2702_s28, 4  ;;  %s2618_s18 = int_to_ptr.vmem [resolvable:$false] %s2617_s18 }
  0xf1   : > { %3512 = vst [vmem:[#allocation29_spill] sm:$0xff] %v3107_v18  ;;  %2139 = vmatprep.subr.bf16.mxu0 %v3099_v14  ;;  %v3122_v22 = vld [vmem:[#allocation10 + $0x8] sm:$0xff]  ;;  %v3131_v25 = vld [vmem:[#allocation11 + $0x10] sm:$0xff]  ;;  %v3138_v27 = vpack.c.bf16 %v3118_v21, %v3116_v20  ;;  %v3155_v32 = vld [vmem:[#allocation11 + $0x20] sm:$0xff]  ;;  %s2619_s22 = scalar_lea.vmem %s2618_s18, 1024  ;;  %p2620_p13 = scmp.lt.s32.totalorder %s3385_s1, %s2618_s18 }
  0xf2   : > { %1847 = vmatmul.mubr.msk.f32.vlgmr.msra.gmra.mrb[0].mxu1 %vm511_vm0, %v3089_v9  ;;  %2141 = vmatpush3.bf16.msra.mxu0 %v3099_v14  ;;  %3513 = vst [vmem:[#allocation30_spill] sm:$0xff] %v3131_v25  ;;  %v3133_v26 = vld [vmem:[#allocation11 + $0x18] sm:$0xff]  ;;  %v469_v28 = vadd.f32 %v3122_v22, %v3089_v9  ;;  %v3144_v29 = vld [vmem:[#allocation13 + $0x30] sm:$0xff]  ;;  %3515 = vst [vmem:[#allocation32_spill] sm:$0xff] %v3155_v32  ;;  %v2170_v62 = vpack.c.bf16 %v471_v60, %v470_v59  ;;  %p2616_p11 = pneg %p2615_p4  ;;  %p2621_p7 = scmp.lt.s32.totalorder %s2619_s22, %s2613_s10 }
  0xf3   : > { %2101 = vmatpush3.bf16.msra.mxu1 %v2098_v8  ;;  %1853 = vmatprep.mubr.msk.f32.mxu1 %vm511_vm0, %v3095_v12  ;;  %3514 = vst [vmem:[#allocation31_spill] sm:$0xff] %v3133_v26  ;;  %v3146_v30 = vld [vmem:[#allocation13 + $0x38] sm:$0xff]  ;;  %v3152_v31 = vpack.c.bf16 %v3133_v26, %v3131_v25  ;;  %v3157_v33 = vld [vmem:[#allocation11 + $0x28] sm:$0xff]  ;;  %v3165_v35 = vld [vmem:[#allocation13 + $0x40] sm:$0xff]  ;;  %v472_v4 = vadd.f32 %v3101_v15, %v3131_v25 }
  0xf4   : > { %2103 = vmatprep.subr.bf16.mxu1 %v2102_v13  ;;  %2143 = vmatprep.subr.bf16.mxu0 %v3111_v19  ;;  %3516 = vst [vmem:[#allocation33_spill] sm:$0xff] %v3157_v33  ;;  %v3162_v34 = vpack.c.bf16 %v3146_v30, %v3144_v29  ;;  %v3167_v36 = vld [vmem:[#allocation13 + $0x48] sm:$0xff]  ;;  %v3173_v37 = vpack.c.bf16 %v3157_v33, %v3155_v32  ;;  %v3176_v38 = vld [vmem:[#allocation11 + $0x30] sm:$0xff]  ;;  %v3178_v39 = vld [vmem:[#allocation11 + $0x38] sm:$0xff]  ;;  %p2622_p9 = por %p2621_p7, %p2620_p13 }
  0xf5   : > { %v3183_v40 = vpack.c.bf16 %v3167_v36, %v3165_v35  ;;  %v3189_v41 = vpack.c.bf16 %v3178_v39, %v3176_v38  ;;  %v3192_v42 = vld [vmem:[#allocation11 + $0x40] sm:$0xff]  ;;  %v3194_v43 = vld [vmem:[#allocation11 + $0x48] sm:$0xff]  ;;  %v3204_v45 = vld [vmem:[#allocation11 + $0x50] sm:$0xff]  ;;  %v473_v5 = vadd.f32 %v3103_v16, %v3133_v26  ;;  %v474_v59 = vadd.f32 %v3116_v20, %v3155_v32 }
  0xf6   : > { %1854 = vmatmul.mubr.msk.f32.vlgmr.msra.gmra.mrb[2].mxu1 %vm511_vm0, %v3122_v22  ;;  %2145 = vmatpush3.bf16.msra.mxu0 %v3111_v19  ;;  %v3201_v44 = vpack.c.bf16 %v3194_v43, %v3192_v42  ;;  %v3206_v46 = vld [vmem:[#allocation11 + $0x58] sm:$0xff]  ;;  %v3217_v48 = vld [vmem:[#allocation11 + $0x60] sm:$0xff]  ;;  %v3219_v49 = vld [vmem:[#allocation11 + $0x68] sm:$0xff]  ;;  %v475_v60 = vadd.f32 %v3118_v21, %v3157_v33  ;;  %v476_v16 = vadd.f32 %v3144_v29, %v3176_v38  ;;  %p2623_p12 = pnand %p2622_p9, %p2616_p11 }
  0xf7   : > { %2105 = vmatpush3.bf16.msra.mxu1 %v2102_v13  ;;  %1860 = vmatprep.mubr.msk.f32.mxu1 %vm511_vm0, %v468_v23  ;;  %v3212_v47 = vpack.c.bf16 %v3206_v46, %v3204_v45  ;;  %v3223_v50 = vpack.c.bf16 %v3219_v49, %v3217_v48  ;;  %v3226_v51 = vld [vmem:[#allocation13 + $0x50] sm:$0xff]  ;;  %v3228_v52 = vld [vmem:[#allocation13 + $0x58] sm:$0xff]  ;;  %v3246_v57 = vld [vmem:[#allocation13 + $0x60] sm:$0xff] }
  0xf8   : > { %2107 = vmatprep.subr.bf16.mxu1 %v3128_v24  ;;  %2147 = vmatprep.subr.bf16.mxu0 %v3138_v27  ;;  %v3233_v53 = vpack.c.bf16 %v3228_v52, %v3226_v51  ;;  %v3235_v54 = vld [vmem:[#allocation11 + $0x70] sm:$0xff]  ;;  %v3237_v55 = vld [vmem:[#allocation11 + $0x78] sm:$0xff]  ;;  %v3248_v58 = vld [vmem:[#allocation13 + $0x68] sm:$0xff]  ;;  %v2178_v26 = vpack.c.bf16 %v475_v60, %v474_v59 }
  0xf9   : > { %v3241_v56 = vpack.c.bf16 %v3237_v55, %v3235_v54  ;;  %v3257_v61 = vpack.c.bf16 %v3248_v58, %v3246_v57  ;;  %v3261_v63 = vld [vmem:[#allocation13 + $0x70] sm:$0xff]  ;;  %v3263_v0 = vld [vmem:[#allocation13 + $0x78] sm:$0xff] }
  0xfa   : > { %1861 = vmatmul.mubr.msk.f32.vlgmr.msra.gmra.mrb[4].mxu1 %vm511_vm0, %v469_v28  ;;  %2149 = vmatpush3.bf16.msra.mxu0 %v3138_v27  ;;  %v3267_v1 = vpack.c.bf16 %v3263_v0, %v3261_v63  ;;  %v2174_v28 = vpack.c.bf16 %v473_v5, %v472_v4  ;;  %v477_v4 = vadd.f32 %v3146_v30, %v3178_v39 }
  0xfb   : > { %2109 = vmatpush3.bf16.msra.mxu1 %v3128_v24  ;;  %2151 = vmatprep.subr.bf16.mxu0 %v3162_v34 }
  0xfc   : > { %2111 = vmatprep.subr.bf16.mxu1 %v3152_v31 }
  0xfe   : > { %2153 = vmatpush3.bf16.msra.mxu0 %v3162_v34 }
  0xff   : > { %2113 = vmatpush3.bf16.msra.mxu1 %v3152_v31  ;;  %2155 = vmatprep.subr.bf16.mxu0 %v3183_v40 }
 0x100   : > { %2115 = vmatprep.subr.bf16.mxu1 %v3173_v37 }
 0x102   : > { %2157 = vmatpush3.bf16.msra.mxu0 %v3183_v40 }
 0x103   : > { %2117 = vmatpush3.bf16.msra.mxu1 %v3173_v37  ;;  %2159 = vmatprep.subr.bf16.mxu0 %v3233_v53 }
 0x104   : > { %2119 = vmatprep.subr.bf16.mxu1 %v3189_v41 }
 0x106   : > { %2161 = vmatpush3.bf16.msra.mxu0 %v3233_v53 }
 0x107   : > { %2121 = vmatpush3.bf16.msra.mxu1 %v3189_v41  ;;  %2163 = vmatprep.subr.bf16.mxu0 %v3257_v61 }
 0x108   : > { %2123 = vmatprep.subr.bf16.mxu1 %v3201_v44 }
 0x10a   : > { %2165 = vmatpush3.bf16.msra.mxu0 %v3257_v61 }
 0x10b   : > { %2125 = vmatpush3.bf16.msra.mxu1 %v3201_v44  ;;  %2167 = vmatprep.subr.bf16.mxu0 %v3267_v1 }
 0x10c   : > { %2127 = vmatprep.subr.bf16.mxu1 %v3212_v47 }
 0x10e   : > { %2169 = vmatpush3.bf16.msra.mxu0 %v3267_v1 }
 0x10f   : > { %2129 = vmatpush3.bf16.msra.mxu1 %v3212_v47 }
 0x110   : > { %2131 = vmatprep.subr.bf16.mxu1 %v3223_v50 }
 0x113   : > { %2133 = vmatpush3.bf16.msra.mxu1 %v3223_v50 }
 0x114   : > { %2135 = vmatprep.subr.bf16.mxu1 %v3241_v56 }
 0x117   : > { %2137 = vmatpush3.bf16.msra.mxu1 %v3241_v56 }
 0x118   : > { %2171 = vmatprep.subr.bf16.mxu1 %v2170_v62 }
 0x1c5   : > { %v1848_v2 = vpop.f32.mrb[0].mxu1 }
 0x1c6   : > { %v584_v3 = vpop.f32.mrb[1].mxu1 }
 0x1c9   : > { %v1855_v7 = vpop.f32.mrb[2].mxu1 }
 0x1ca   : > { %v756_v8 = vsub.f32 %v1848_v2, %v1855_v7  ;;  %v665_v13 = vpop.f32.mrb[3].mxu1 }
 0x1cb   : > { %v755_v23 = vsub.f32 %v584_v3, %v665_v13 }
 0x1cd   : > { %v1862_v18 = vpop.f32.mrb[4].mxu1  ;;  %1895 = vmatprep.mubr.f32.mxu1 %v755_v23 }
 0x1ce   : > { %v758_v11 = vsub.f32 %v1862_v18, %v1848_v2  ;;  %v746_v17 = vpop.f32.mrb[5].mxu1  ;;  %1896 = vmatmul.mubr.f32.vlgmr.msra.gmra.mrb[6].mxu1 %v756_v8  ;;  %v2182_v18 = vpack.c.bf16 %v477_v4, %v476_v16  ;;  %v482_v2 = vadd.f32 %v3246_v57, %v3217_v48 }
 0x1cf   : > { %v757_v25 = vsub.f32 %v746_v17, %v584_v3  ;;  %2173 = vmatpush3.bf16.msra.mxu1 %v2170_v62  ;;  %v478_v17 = vadd.f32 %v3165_v35, %v3192_v42  ;;  %v480_v62 = vadd.f32 %v3226_v51, %v3204_v45  ;;  %v484_v3 = vadd.f32 %v3261_v63, %v3235_v54 }
 0x1d0   : > { %v760_v15 = vsub.f32 %v758_v11, %v1855_v7  ;;  %2175 = vmatprep.subr.bf16.mxu1 %v2174_v28  ;;  %v479_v11 = vadd.f32 %v3167_v36, %v3194_v43  ;;  %v485_v7 = vadd.f32 %v3263_v0, %v3237_v55 }
 0x1d1   : > { %v759_v5 = vsub.f32 %v757_v25, %v665_v13 }
 0x1d2   : > { %v762_v32 = vadd.f32 %v760_v15, %v756_v8  ;;  %v2186_v25 = vpack.c.bf16 %v479_v11, %v478_v17  ;;  %v2198_v8 = vpack.c.bf16 %v485_v7, %v484_v3 }
 0x1d3   : > { %2177 = vmatpush3.bf16.msra.mxu1 %v2174_v28  ;;  %v761_v33 = vadd.f32 %v759_v5, %v755_v23  ;;  %1930 = vmatprep.mubr.f32.mxu0 %v759_v5  ;;  %v995_v23 = vld [vmem:[%s3075_s24 + $0x8] sm:$0xff] }
 0x1d4   : > { %1931 = vmatmul.mubr.f32.vlgmr.msra.gmra.mrb[0].mxu0 %v760_v15  ;;  %2179 = vmatprep.subr.bf16.mxu1 %v2178_v26  ;;  %v481_v15 = vadd.f32 %v3228_v52, %v3206_v46 }
 0x1d5   : > { %1965 = vmatprep.mubr.f32.mxu1 %v761_v33  ;;  %1972 = vmatprep.mubr.msk.f32.mxu0 %vm511_vm0, %v3085_v6  ;;  %v483_v33 = vadd.f32 %v3248_v58, %v3219_v49 }
 0x1d6   : > { %v2190_v16 = vpack.c.bf16 %v481_v15, %v480_v62  ;;  %v1692_v62 = vld [vmem:[%s3068_s26 + $0x18] sm:$0xff] }
 0x1d7   : > { %2181 = vmatpush3.bf16.msra.mxu1 %v2178_v26  ;;  %v2194_v26 = vpack.c.bf16 %v483_v33, %v482_v2  ;;  %v1691_v2 = vld [vmem:[%s3068_s26 + $0x10] sm:$0xff] }
 0x1d8   : > { %2183 = vmatprep.subr.bf16.mxu1 %v2182_v18 }
 0x1db   : > { %2185 = vmatpush3.bf16.msra.mxu1 %v2182_v18 }
 0x1dc   : > { %2187 = vmatprep.subr.bf16.mxu1 %v2186_v25 }
 0x1df   : > { %2189 = vmatpush3.bf16.msra.mxu1 %v2186_v25 }
 0x1e0   : > { %2191 = vmatprep.subr.bf16.mxu1 %v2190_v16 }
 0x1e3   : > { %2193 = vmatpush3.bf16.msra.mxu1 %v2190_v16 }
 0x1e4   : > { %2195 = vmatprep.subr.bf16.mxu1 %v2194_v26 }
 0x1e7   : > { %2197 = vmatpush3.bf16.msra.mxu1 %v2194_v26 }
 0x1e8   : > { %2199 = vmatprep.subr.bf16.mxu1 %v2198_v8 }
 0x1eb   : > { %2201 = vmatpush3.bf16.msra.mxu1 %v2198_v8 }
 0x1ec   : > { %2247 = vmatprep.subr.bf16.mxu1 %v3099_v14 }
 0x1ee   : > { %1966 = vmatmul.mubr.f32.vlgmr.msra.gmra.mrb[8].mxu1 %v762_v32  ;;  %v997_v32 = vld [vmem:[%s3068_s26 + $0x8] sm:$0xff] }
 0x1ef   : > { %2249 = vmatpush3.bf16.msra.mxu1 %v3099_v14 }
 0x1f0   : > { %2251 = vmatprep.subr.bf16.mxu1 %v3111_v19 }
 0x1f3   : > { %2253 = vmatpush3.bf16.msra.mxu1 %v3111_v19 }
 0x1f4   : > { %2255 = vmatprep.subr.bf16.mxu1 %v3138_v27 }
 0x1f7   : > { %2257 = vmatpush3.bf16.msra.mxu1 %v3138_v27 }
 0x1f8   : > { %2259 = vmatprep.subr.bf16.mxu1 %v3162_v34 }
 0x1fb   : > { %2261 = vmatpush3.bf16.msra.mxu1 %v3162_v34 }
 0x1fc   : > { %2263 = vmatprep.subr.bf16.mxu1 %v3183_v40 }
 0x1ff   : > { %2265 = vmatpush3.bf16.msra.mxu1 %v3183_v40  ;;  %v996_v40 = vld [vmem:[%s3068_s26] sm:$0xff] }
 0x200   : > { %2267 = vmatprep.subr.bf16.mxu1 %v3233_v53 }
 0x203   : > { %2269 = vmatpush3.bf16.msra.mxu1 %v3233_v53  ;;  %v994_v53 = vld [vmem:[%s3075_s24] sm:$0xff] }
 0x204   : > { %2271 = vmatprep.subr.bf16.mxu1 %v3257_v61 }
 0x207   : > { %2273 = vmatpush3.bf16.msra.mxu1 %v3257_v61 }
 0x208   : > { %2275 = vmatprep.subr.bf16.mxu1 %v3267_v1 }
 0x20b   : > { %2277 = vmatpush3.bf16.msra.mxu1 %v3267_v1 }
 0x2a1   : > { %v1897_v14 = vpop.f32.mrb[6].mxu1 }
 0x2a2   : > { %v829_v19 = vpop.f32.mrb[7].mxu1 }
 0x2a7   : > { %v1932_v27 = vpop.f32.mrb[0].mxu0 }
 0x2a8   : > { %v989_v34 = vsub.f32 %v1897_v14, %v1932_v27  ;;  %v904_v13 = vpop.f32.mrb[1].mxu0 }
 0x2a9   : > { %v988_v28 = vsub.f32 %v829_v19, %v904_v13 }
 0x2aa   : > { %v1002_v59 = vsub.f32 %v997_v32, %v989_v34 }
 0x2ab   : > { %v1001_v60 = vsub.f32 %v996_v40, %v988_v28 }
 0x2ac   : > { %v1004_v4 = vmul.f32 %v1002_v59, %v995_v23 }
 0x2ad   : > { %v1003_v61 = vmul.f32 %v1001_v60, %v994_v53 }
 0x2ae   : > { %v1006_v5 = vadd.f32 %v1004_v4, %v989_v34 }
 0x2af   : > { %v1005_v18 = vadd.f32 %v1003_v61, %v988_v28 }
 0x2b1   : > { %v2202_v17 = vpack.c.bf16 %v1006_v5, %v1005_v18 }
 0x2b3   : > { %2203 = vmatprep.subr.bf16.mxu0 %v2202_v17 }
 0x2b4   : > { %2205 = vmatpush3.bf16.msra.mxu0 %v2202_v17  ;;  %v3525_v17 = vld [vmem:[#allocation33_spill] sm:$0xff] }
 0x2b7   : > { %1973 = vmatmul.mubr.msk.f32.vlgmr.msra.gmra.mrb[2].mxu0 %vm511_vm0, %v3089_v9 }
 0x2b8   : > { %1979 = vmatprep.mubr.msk.f32.mxu0 %vm511_vm0, %v3095_v12 }
 0x2c1   : > { %v1967_v1 = vpop.f32.mrb[8].mxu1 }
 0x2c2   : > { %v991_v11 = vsub.f32 %v1967_v1, %v1897_v14  ;;  %v979_v25 = vpop.f32.mrb[9].mxu1  ;;  %v486_v14 = vsub.f32 %v3085_v6, %v3095_v12  ;;  %v3517_v6 = vld [vmem:[#allocation28_spill] sm:$0xff]  ;;  %v3518_v12 = vld [vmem:[#allocation25_spill] sm:$0xff]  ;;  %v493_v1 = vsub.f32 %v3525_v17, %v3118_v21 }
 0x2c3   : > { %v990_v15 = vsub.f32 %v979_v25, %v829_v19  ;;  %v487_v19 = vsub.f32 %v3089_v9, %v3122_v22  ;;  %v488_v9 = vsub.f32 %v3517_v6, %v3091_v10  ;;  %v3524_v10 = vld [vmem:[#allocation32_spill] sm:$0xff] }
 0x2c4   : > { %v993_v16 = vsub.f32 %v991_v11, %v1932_v27 }
 0x2c5   : > { %v992_v33 = vsub.f32 %v990_v15, %v904_v13  ;;  %v3522_v13 = vld [vmem:[#allocation27_spill] sm:$0xff] }
 0x2c6   : > { %v1008_v26 = vsub.f32 %v1692_v62, %v993_v16 }
 0x2c7   : > { %v1007_v3 = vsub.f32 %v1691_v2, %v992_v33 }
 0x2c8   : > { %v1010_v7 = vmul.f32 %v1008_v26, %v995_v23  ;;  %v3523_v23 = vld [vmem:[#allocation31_spill] sm:$0xff]  ;;  %v495_v26 = vsub.f32 %v3178_v39, %v3146_v30  ;;  %v498_v30 = vsub.f32 %v3204_v45, %v3226_v51 }
 0x2c9   : > { %v1009_v8 = vmul.f32 %v1007_v3, %v994_v53 }
 0x2ca   : > { %v1012_v32 = vadd.f32 %v1010_v7, %v993_v16 }
 0x2cb   : > { %v1011_v34 = vadd.f32 %v1009_v8, %v992_v33  ;;  %v494_v33 = vsub.f32 %v3176_v38, %v3144_v29  ;;  %v496_v8 = vsub.f32 %v3192_v42, %v3165_v35  ;;  %v499_v38 = vsub.f32 %v3206_v46, %v3228_v52 }
 0x2cc   : > { %v1014_v40 = vadd.f32 %v1012_v32, %v1006_v5  ;;  %v501_v35 = vsub.f32 %v3219_v49, %v3248_v58  ;;  %v502_v42 = vsub.f32 %v3235_v54, %v3261_v63 }
 0x2cd   : > { %v2206_v28 = vpack.c.bf16 %v1012_v32, %v1011_v34  ;;  %v1013_v59 = vadd.f32 %v1011_v34, %v1005_v18  ;;  %v492_v18 = vsub.f32 %v3524_v10, %v3116_v20  ;;  %v2290_v7 = vpack.c.bf16 %v495_v26, %v494_v33 }
 0x2ce   : > { %v497_v32 = vsub.f32 %v3194_v43, %v3167_v36  ;;  %v2298_v39 = vpack.c.bf16 %v499_v38, %v498_v30  ;;  %v500_v34 = vsub.f32 %v3217_v48, %v3246_v57  ;;  %v503_v43 = vsub.f32 %v3237_v55, %v3263_v0 }
 0x2cf   : > { %2207 = vmatprep.subr.bf16.mxu0 %v2206_v28  ;;  %v2210_v60 = vpack.c.bf16 %v1014_v40, %v1013_v59  ;;  %v2286_v2 = vpack.c.bf16 %v493_v1, %v492_v18 }
 0x2d0   : > { %2209 = vmatpush3.bf16.msra.mxu0 %v2206_v28  ;;  %v2294_v29 = vpack.c.bf16 %v497_v32, %v496_v8  ;;  %v2302_v36 = vpack.c.bf16 %v501_v35, %v500_v34  ;;  %v2306_v45 = vpack.c.bf16 %v503_v43, %v502_v42 }
 0x2d1   : > { %2211 = vmatprep.subr.bf16.mxu0 %v2210_v60 }
 0x2d3   : > { %1980 = vmatmul.mubr.msk.f32.vlgmr.msra.gmra.mrb[4].mxu0 %vm511_vm0, %v3122_v22  ;;  %v3519_v22 = vld [vmem:[#allocation29_spill] sm:$0xff] }
 0x2d4   : > { %2213 = vmatpush3.bf16.msra.mxu0 %v2210_v60  ;;  %1986 = vmatprep.mubr.msk.f32.mxu0 %vm511_vm0, %v486_v14 }
 0x2d5   : > { %2215 = vmatprep.subr.bf16.mxu0 %v3128_v24 }
 0x2d7   : > { %1987 = vmatmul.mubr.msk.f32.vlgmr.msra.gmra.mrb[6].mxu0 %vm511_vm0, %v487_v19 }
 0x2d8   : > { %2217 = vmatpush3.bf16.msra.mxu0 %v3128_v24  ;;  %v489_v24 = vsub.f32 %v3519_v22, %v3518_v12 }
 0x2d9   : > { %2219 = vmatprep.subr.bf16.mxu0 %v3152_v31 }
 0x2dc   : > { %2221 = vmatpush3.bf16.msra.mxu0 %v3152_v31  ;;  %v2278_v31 = vpack.c.bf16 %v489_v24, %v488_v9 }
 0x2dd   : > { %2223 = vmatprep.subr.bf16.mxu0 %v3173_v37 }
 0x2e0   : > { %2225 = vmatpush3.bf16.msra.mxu0 %v3173_v37 }
 0x2e1   : > { %2227 = vmatprep.subr.bf16.mxu0 %v3189_v41 }
 0x2e4   : > { %2229 = vmatpush3.bf16.msra.mxu0 %v3189_v41 }
 0x2e5   : > { %2231 = vmatprep.subr.bf16.mxu0 %v3201_v44 }
 0x2e8   : > { %2233 = vmatpush3.bf16.msra.mxu0 %v3201_v44  ;;  %v3520_v44 = vld [vmem:[#allocation26_spill] sm:$0xff] }
 0x2e9   : > { %2235 = vmatprep.subr.bf16.mxu0 %v3212_v47 }
 0x2ec   : > { %2237 = vmatpush3.bf16.msra.mxu0 %v3212_v47  ;;  %v3521_v47 = vld [vmem:[#allocation30_spill] sm:$0xff] }
 0x2ed   : > { %2239 = vmatprep.subr.bf16.mxu0 %v3223_v50  ;;  %v490_v27 = vsub.f32 %v3521_v47, %v3520_v44 }
 0x2f0   : > { %2241 = vmatpush3.bf16.msra.mxu0 %v3223_v50  ;;  %v491_v50 = vsub.f32 %v3523_v23, %v3522_v13 }
 0x2f1   : > { %2243 = vmatprep.subr.bf16.mxu0 %v3241_v56 }
 0x2f2   : > { %v2282_v5 = vpack.c.bf16 %v491_v50, %v490_v27 }
 0x2f4   : > { %2245 = vmatpush3.bf16.msra.mxu0 %v3241_v56 }
 0x2f5   : > { %2279 = vmatprep.subr.bf16.mxu0 %v2278_v31 }
 0x38a   : > { %v1974_v37 = vpop.f32.mrb[2].mxu0 }
 0x38b   : > { %v1081_v41 = vpop.f32.mrb[3].mxu0 }
 0x3a6   : > { %v1981_v53 = vpop.f32.mrb[4].mxu0 }
 0x3a7   : > { %v1247_v4 = vadd.f32 %v1981_v53, %v1974_v37  ;;  %v1156_v61 = vpop.f32.mrb[5].mxu0 }
 0x3a8   : > { %v1246_v56 = vadd.f32 %v1156_v61, %v1081_v41 }
 0x3aa   : > { %v1988_v11 = vpop.f32.mrb[6].mxu0  ;;  %2021 = vmatprep.mubr.f32.mxu0 %v1246_v56 }
 0x3ab   : > { %v1249_v25 = vsub.f32 %v1988_v11, %v1974_v37  ;;  %v1237_v62 = vpop.f32.mrb[7].mxu0  ;;  %2022 = vmatmul.mubr.f32.vlgmr.msra.gmra.mrb[8].mxu0 %v1247_v4 }
 0x3ac   : > { %v1248_v15 = vsub.f32 %v1237_v62, %v1081_v41  ;;  %2281 = vmatpush3.bf16.msra.mxu0 %v2278_v31 }
 0x3ad   : > { %v1251_v16 = vadd.f32 %v1981_v53, %v1249_v25  ;;  %2283 = vmatprep.subr.bf16.mxu0 %v2282_v5 }
 0x3ae   : > { %v1250_v20 = vadd.f32 %v1248_v15, %v1156_v61 }
 0x3af   : > { %v1253_v3 = vadd.f32 %v1251_v16, %v1247_v4 }
 0x3b0   : > { %2285 = vmatpush3.bf16.msra.mxu0 %v2282_v5  ;;  %2056 = vmatprep.mubr.f32.mxu1 %v1250_v20  ;;  %v1252_v21 = vadd.f32 %v1250_v20, %v1246_v56 }
 0x3b1   : > { %2057 = vmatmul.mubr.f32.vlgmr.msra.gmra.mrb[10].mxu1 %v1251_v16  ;;  %2287 = vmatprep.subr.bf16.mxu0 %v2286_v2 }
 0x3b2   : > { %2091 = vmatprep.mubr.f32.mxu0 %v1252_v21 }
 0x3b4   : > { %2289 = vmatpush3.bf16.msra.mxu0 %v2286_v2 }
 0x3b5   : > { %2291 = vmatprep.subr.bf16.mxu0 %v2290_v7 }
 0x3b8   : > { %2293 = vmatpush3.bf16.msra.mxu0 %v2290_v7 }
 0x3b9   : > { %2295 = vmatprep.subr.bf16.mxu0 %v2294_v29 }
 0x3bc   : > { %2297 = vmatpush3.bf16.msra.mxu0 %v2294_v29 }
 0x3bd   : > { %2299 = vmatprep.subr.bf16.mxu0 %v2298_v39 }
 0x3c0   : > { %2301 = vmatpush3.bf16.msra.mxu0 %v2298_v39 }
 0x3c1   : > { %2303 = vmatprep.subr.bf16.mxu0 %v2302_v36 }
 0x3c4   : > { %2305 = vmatpush3.bf16.msra.mxu0 %v2302_v36 }
 0x3c5   : > { %2307 = vmatprep.subr.bf16.mxu0 %v2306_v45 }
 0x3c8   : > { %2309 = vmatpush3.bf16.msra.mxu0 %v2306_v45 }
 0x3cb   : > { %2092 = vmatmul.mubr.f32.vlgmr.msra.gmra.mrb[10].mxu0 %v1253_v3 }
 0x47e   : > { %v2023_v46 = vpop.f32.mrb[8].mxu0 }
 0x47f   : > { %v1320_v48 = vpop.f32.mrb[9].mxu0 }
 0x484   : > { %v2058_v49 = vpop.f32.mrb[10].mxu1 }
 0x485   : > { %v1480_v51 = vadd.f32 %v2058_v49, %v2023_v46  ;;  %v1395_v52 = vpop.f32.mrb[11].mxu1 }
 0x486   : > { %v1479_v57 = vadd.f32 %v1395_v52, %v1320_v48 }
 0x487   : > { %1486 = vst [vmem:[%s431_s30 + $0x8] sm:$0xff] %v1480_v51 }
 0x488   : > { %1485 = vst [vmem:[%s431_s30] sm:$0xff] %v1479_v57 }
 0x49e   : > { %v2093_v54 = vpop.f32.mrb[10].mxu0 }
 0x49f   : > { %v1482_v55 = vsub.f32 %v2093_v54, %v2023_v46  ;;  %v1470_v58 = vpop.f32.mrb[11].mxu0 }
 0x4a0   : > { %v1481_v63 = vsub.f32 %v1470_v58, %v1320_v48 }
 0x4a1   : > { %v1484_v0 = vadd.f32 %v2058_v49, %v1482_v55 }
 0x4a2   : > { %v1483_v40 = vadd.f32 %v1481_v63, %v1395_v52 }
 0x4a3   : > { %1700 = vst [vmem:[%s431_s30 + $0x18] sm:$0xff] %v1484_v0 }
 0x4a4   : > { %1699 = vst [vmem:[%s431_s30 + $0x10] sm:$0xff] %v1483_v40 }
 0x4a5   : > { %2626 = shalt.err (!%p2623_p12)
}
 0x4a6   : > { %s2627_s17 = scalar_lea.hbm %s3390_s8, 512  ;;  %s2631_s16 = scalar_lea.hbm %s3441_s7, 1024 }
 0x4a7   : > { %p2628_p8 = scmp.ne.s32.totalorder %s3390_s8, %s2627_s17  ;;  %p2632_p1 = scmp.lt.u32.totalorder %s3390_s8, %s3441_s7 }
 0x4a8   : > { %p2633_p6 = scmp.lt.u32.totalorder %s2631_s16, %s2627_s17  ;;  %p2635_p5 = scmp.lt.u32.totalorder %s2627_s17, %s3390_s8 }
 0x4a9   : > { %p2629_p10 = pnand %p2628_p8, %p3526_p2 }
 0x4aa   : > { %p2634_p3 = por %p2633_p6, %p2632_p1 }
 0x4ab   : > { %p2630_p0 = pneg %p2629_p10 }
 0x4ac   : > { %p2636_p4 = por %p2635_p5, %p2634_p3 }
 0x4ae   : > { %p2637_p11 = pnand %p2636_p4, %p2630_p0 }
 0x4b0   : > { %2640 = shalt.err (!%p2637_p11)
}
 0x4b1   : > { %s2703_s9 = smov 128   ;;  %s2704_s21 = smov 8  }
 0x4b2   : > { %2332 = dma.vmem_to_hbm [thread:$0]  (%p3526_p2), %s3385_s1, 512, %s3390_s8, %s1491_s13, %s2703_s9, %s2703_s9, %s2704_s21  }
 0x4b3 PF: > { %s3527_s26 = sld [smem:[#allocation20_spill]]  ;;  %s3528_s14 = sld [smem:[#allocation22_spill]] }
 0x4b4   : > { %p3530_p7 = scmp.ge.s32.totalorder %s2691_s27, 2 }
 0x4b9   : > { %s1519_s24 = sand.u32 1, %s3527_s26   ;;  %p3529_p13 = scmp.ne.s32.totalorder %s3528_s14, 0 }
 0x4ba   : > { %s1520_s30 = scalar_lea.sflag [#allocation4], %s1519_s24 }
 0x4bb   : > { %p2358_p9 = pnand %p3530_p7, %p3529_p13 }
 0x4bd   : > { %2674 = dma.done.wait (!%p2358_p9), %s1520_s30, 512  }
 0x4be   : > { %2676 = vsyncadd (!%p2358_p9), %s1520_s30, 4294966784  ;;  %s3531_s27 = sld [smem:[#allocation23_spill]]  ;;  %s3532_s20 = sld [smem:[#allocation21_spill]] }
 0x4bf   : > { %s3533_s26 = sld [smem:[#allocation24_spill]]  ;;  %s3534_s24 = smov %s2683_s25 }
 0x4c4   : > { %p25_p12 = scmp.ge.s32.totalorder %s3531_s27, 4   ;;  %s3535_s25 = smov %s3532_s20 }
 0x4c6   :  { %27 = sbr.rel (!%p25_p12) target bundleno = 13 (0xd), region = 136 }
 0x4cd   :  { %1525 = vsyncpa [#allocation3], 1 }
 0x4ce   :  { %1527 = vsyncpa [#allocation3 + $0x1], 1 }
 0x4cf   :  { %1528 = vsyncpa [#allocation6], 1 }
 0x4d0   :  { %1530 = vsyncpa [#allocation6 + $0x1], 1 }
 0x4d1   :  { %1531 = vsyncpa [#allocation9], 1 }
 0x4d2   :  { %1532 = vsyncpa [#allocation12], 1 }
 0x4d3   :  { %1533 = vsyncpa [#allocation4], 1 }
 0x4d4   :  { %1535 = vsyncpa [#allocation4 + $0x1], 1 }

</bundles_post_ra>
